<compile_context>
chip_gen: v6e
topology: v6e:2x2x1
jax: 0.10.0
libtpu: 0.0.40
codegen_flags: <defaults>
</compile_context>

<pallas_src>
import math

import numpy as np
import jax
import jax.numpy as jnp
from jax.experimental import pallas as pl
from jax.experimental.pallas import tpu as pltpu

# ----- module hyper-parameters (mirroring OrderNetwork.__init__ defaults) -----
INPUT_DIM = 1
HIDDEN_LAYERS = 3
NEURONS = 30
ALPHA_BOUNDS = (1.0, 2.0)          # constraint_type='tanh'
X_MEAN, X_STD = 0.5, 0.5           # registered buffers

# ----- TPU packing parameters -----
SUBLANE = 8
XCOLS = 8                          # packed-sample columns carried in x / out
VEC_ROWS = 16                      # rows of the packed vector slab (padded)
TM_MAX = 2048                      # max batch-row tile (rows of packed samples)


def _select_packing():
    """K samples per row / lane width, per chip generation.

    v6e/v7x MXUs are 256 wide -> pack 8x30=240 of 256 lanes.
    v5e (and older) MXUs are 128 wide -> pack 4x30=120 of 128 lanes.
    """
    try:
        kind = jax.devices()[0].device_kind.lower()
    except Exception:
        kind = ""
    if any(t in kind for t in ("v2", "v3", "v4", "v5")):
        return 4, 128
    return 8, 256


K, LANE = _select_packing()

assert K * NEURONS <= LANE
assert K <= XCOLS
assert XCOLS + 4 <= VEC_ROWS        # spread rows + b1' + b2 + b3 + b4


def _round_up(v, m):
    return ((v + m - 1) // m) * m


# --------------------------------------------------------------------------- #
# Kernel
# --------------------------------------------------------------------------- #
def _order_network_kernel(x_ref, wmat_ref, w4_ref, vecs_ref, out_ref):
    """Full MLP forward + bound constraint on one (TM, XCOLS) tile of samples.

    x_ref   : (TM, XCOLS)        K valid packed samples per row (rest zero)
    wmat_ref: (2, LANE, LANE)    block-diagonal W2, W3
    w4_ref  : (LANE, XCOLS)      W4 block j in column j (j < K), rest zero
    vecs_ref: (VEC_ROWS, LANE)   rows 0..XCOLS-1: layer-1 spread matrix (norm
                                 folded in); row XCOLS: b1'; +1: b2; +2: b3;
                                 +3: b4 (scalar broadcast)
    out_ref : (TM, XCOLS)        constrained alpha per packed sample (K valid)
    """
    a_lo, a_hi = ALPHA_BOUNDS
    half_span = (a_hi - a_lo) * 0.5
    mid = (a_lo + a_hi) * 0.5

    x8 = x_ref[...]                                          # (TM, XCOLS)

    # --- Layer 1: one small MXU pass (TM,8)x(8,LANE); normalization folded in.
    h = jnp.tanh(
        jnp.dot(x8, vecs_ref[0:XCOLS, :], preferred_element_type=jnp.float32)
        + vecs_ref[XCOLS:XCOLS + 1, :])                      # (TM, LANE)

    # --- Hidden layers 2 & 3: block-diagonal LANE x LANE MXU matmuls.
    h = jnp.tanh(jnp.dot(h, wmat_ref[0], preferred_element_type=jnp.float32)
                 + vecs_ref[XCOLS + 1:XCOLS + 2, :])
    h = jnp.tanh(jnp.dot(h, wmat_ref[1], preferred_element_type=jnp.float32)
                 + vecs_ref[XCOLS + 2:XCOLS + 3, :])

    # --- Output layer Linear(30,1) per packed sample: narrow (LANE,XCOLS)
    #     matmul so the final bias/tanh/scale touch only 8 lanes (EUP trim).
    raw = (jnp.dot(h, w4_ref[...], preferred_element_type=jnp.float32)
           + vecs_ref[XCOLS + 3:XCOLS + 4, 0:XCOLS])         # (TM, XCOLS)
    out_ref[...] = half_span * jnp.tanh(raw) + mid


# --------------------------------------------------------------------------- #
# Host-side parameter preparation (runs ONCE, outside the per-call path)
# --------------------------------------------------------------------------- #
def init_params(key):
    """Deterministic xavier_normal init; biases = 0 (the final bias init is
    arctanh(0) = 0 for the default bounds / tanh constraint)."""
    dims = [INPUT_DIM] + [NEURONS] * HIDDEN_LAYERS + [1]     # [1, 30, 30, 30, 1]
    params = []
    for fan_in, fan_out in zip(dims[:-1], dims[1:]):
        key, sub = jax.random.split(key)
        std = math.sqrt(2.0 / (fan_in + fan_out))            # xavier_normal gain=1
        # PyTorch Linear weight is (out, in); we store (in, out) so x @ W works.
        w = std * jax.random.normal(sub, (fan_in, fan_out), dtype=jnp.float32)
        b = jnp.zeros((fan_out,), dtype=jnp.float32)
        params.append((w, b))
    return params


def prepare_params(params):
    """Fold the input normalization into layer 1 and build the packed /
    block-diagonal weight slabs.  Returns (wmat, w4m, vecs)."""
    (w1, b1), (w2, b2), (w3, b3), (w4, b4) = [
        (np.asarray(w, np.float32), np.asarray(b, np.float32)) for w, b in params
    ]
    inv_std = 1.0 / (X_STD + 1e-8)
    w1_row = w1[0] * inv_std                                 # (NEURONS,)
    b1_fold = b1 - (X_MEAN * inv_std) * w1[0]                # (NEURONS,)

    vecs = np.zeros((VEC_ROWS, LANE), np.float32)
    wmat = np.zeros((2, LANE, LANE), np.float32)
    w4m = np.zeros((LANE, XCOLS), np.float32)
    for j in range(K):
        lo, hi = j * NEURONS, (j + 1) * NEURONS
        vecs[j, lo:hi] = w1_row                              # spread matrix row j
        vecs[XCOLS, lo:hi] = b1_fold                         # b1' tiled
        vecs[XCOLS + 1, lo:hi] = b2                          # b2 tiled
        vecs[XCOLS + 2, lo:hi] = b3                          # b3 tiled
        wmat[0, lo:hi, lo:hi] = w2                           # W2 block-diag
        wmat[1, lo:hi, lo:hi] = w3                           # W3 block-diag
        w4m[lo:hi, j] = w4[:, 0]                             # W4 block -> col j
    vecs[XCOLS + 3, :] = float(b4[0])                        # b4 (scalar)
    return jnp.asarray(wmat), jnp.asarray(w4m), jnp.asarray(vecs)


# --------------------------------------------------------------------------- #
# Tile / grid selection
# --------------------------------------------------------------------------- #
def _choose_tile(rows):
    """Pick the batch-row tile: aim for >=4 grid steps (balances v7x's two
    TensorCores) while capping at TM_MAX to amortize per-step overhead."""
    rows = max(rows, 1)
    tm = _round_up(-(-rows // 4), SUBLANE)
    tm = max(SUBLANE, min(TM_MAX, tm))
    rp = _round_up(rows, tm)
    return tm, rp


# --------------------------------------------------------------------------- #
# Forward wrapper (jitted; padding/packing of x is fused under jit)
# --------------------------------------------------------------------------- #
def _forward_impl(x, wmat, w4m, vecs):
    x = jnp.asarray(x, jnp.float32)
    if x.ndim == 0:
        x = x[None]
    if x.ndim > 1:
        x = x.reshape(-1)                                    # accept (B, 1) inputs
    B = x.shape[0]

    R = -(-B // K)                                           # rows of K samples
    TM, Rp = _choose_tile(R)

    xp = jnp.pad(x, (0, Rp * K - B)).reshape(Rp, K)
    if K < XCOLS:
        xp = jnp.pad(xp, ((0, 0), (0, XCOLS - K)))           # (Rp, XCOLS)

    out = pl.pallas_call(
        _order_network_kernel,
        out_shape=jax.ShapeDtypeStruct((Rp, XCOLS), jnp.float32),
        grid_spec=pltpu.PrefetchScalarGridSpec(
            num_scalar_prefetch=0,
            grid=(Rp // TM,),
            in_specs=[
                pl.BlockSpec((TM, XCOLS), lambda i: (i, 0)),          # x streams
                pl.BlockSpec((2, LANE, LANE), lambda i: (0, 0, 0)),   # resident
                pl.BlockSpec((LANE, XCOLS), lambda i: (0, 0)),        # resident
                pl.BlockSpec((VEC_ROWS, LANE), lambda i: (0, 0)),     # resident
            ],
            out_specs=pl.BlockSpec((TM, XCOLS), lambda i: (i, 0)),
        ),
        compiler_params=pltpu.CompilerParams(
            dimension_semantics=("parallel",),        # v7x: 2 TCs split the batch
            vmem_limit_bytes=32 * 1024 * 1024,        # safe on v5e/v6e/v7x
        ),
    )(xp, wmat, w4m, vecs)

    # (Rp, K) row-major -> flat sample order K*r + j, then drop padding.
    return out[:, :K].reshape(Rp * K, 1)[:B]


order_network_forward = jax.jit(_forward_impl)


# --------------------------------------------------------------------------- #
# Pure-JAX reference of the PyTorch forward (for correctness check)
# --------------------------------------------------------------------------- #
def _reference_forward(x, params):
    x = jnp.asarray(x, jnp.float32).reshape(-1)
    h = ((x - X_MEAN) / (X_STD + 1e-8))[:, None]
    (w1, b1), (w2, b2), (w3, b3), (w4, b4) = params
    h = jnp.tanh(h @ w1 + b1)
    h = jnp.tanh(h @ w2 + b2)
    h = jnp.tanh(h @ w3 + b3)
    raw = h @ w4 + b4
    a, b = ALPHA_BOUNDS
    return (b - a) / 2.0 * jnp.tanh(raw) + (a + b) / 2.0


if __name__ == "__main__":
    key = jax.random.PRNGKey(0)
    pkey, xkey = jax.random.split(key)

    params = init_params(pkey)
    wmat, w4m, vecs = prepare_params(params)   # one-time packing, off hot path

    # Small batch of spatial coordinates in [0, 1] (PINN collocation points).
    B = 16
    x = jax.random.uniform(xkey, (B,), dtype=jnp.float32)

    alpha = jax.block_until_ready(order_network_forward(x, wmat, w4m, vecs))
    ref = _reference_forward(x, params)
    assert alpha.shape == (B, 1)
    assert bool(jnp.all((alpha >= ALPHA_BOUNDS[0]) & (alpha <= ALPHA_BOUNDS[1])))
    assert jnp.allclose(alpha, ref, atol=1e-5, rtol=1e-5), \
        float(jnp.max(jnp.abs(alpha - ref)))

    # (B, 1)-shaped input (PyTorch parity path) must match the 1-D result.
    alpha_2d = jax.block_until_ready(
        order_network_forward(x[:, None], wmat, w4m, vecs))
    assert alpha_2d.shape == (B, 1)
    assert jnp.allclose(alpha_2d, alpha, atol=0.0, rtol=0.0)

    # Ragged batch: exercises multi-step grid + row/column padding.
    B2 = 1029
    x2 = jax.random.uniform(jax.random.PRNGKey(1), (B2,), dtype=jnp.float32)
    alpha2 = jax.block_until_ready(order_network_forward(x2, wmat, w4m, vecs))
    ref2 = _reference_forward(x2, params)
    assert alpha2.shape == (B2, 1)
    assert jnp.allclose(alpha2, ref2, atol=1e-5, rtol=1e-5), \
        float(jnp.max(jnp.abs(alpha2 - ref2)))

    print("KERNEL_OK")
</pallas_src>

<mosaic_0001>
module attributes {stable_mosaic.version = 11 : i64} {
  func.func @_order_network_kernel(%arg0: i32, %arg1: memref<8x8xf32, #tpu.memory_space<vmem>>, %arg2: memref<2x256x256xf32, #tpu.memory_space<vmem>>, %arg3: memref<256x8xf32, #tpu.memory_space<vmem>>, %arg4: memref<16x256xf32, #tpu.memory_space<vmem>>, %arg5: memref<8x8xf32, #tpu.memory_space<vmem>>) attributes {dimension_semantics = [#tpu.dimension_semantics<parallel>], iteration_bounds = array<i64: 1>, scalar_prefetch = 0 : i64, scratch_operands = 0 : i64, tpu.core_type = #tpu.core_type<tc>, window_params = [{transform_indices = @transform_0, window_bounds = array<i64: 8, 8>}, {pipeline_mode = #tpu.pipeline_mode<synchronous>, transform_indices = @transform_1, window_bounds = array<i64: 2, 256, 256>}, {pipeline_mode = #tpu.pipeline_mode<synchronous>, transform_indices = @transform_2, window_bounds = array<i64: 256, 8>}, {pipeline_mode = #tpu.pipeline_mode<synchronous>, transform_indices = @transform_3, window_bounds = array<i64: 16, 256>}, {transform_indices = @transform_4, window_bounds = array<i64: 8, 8>}]} {
    %c0 = arith.constant 0 : index
    %c0_0 = arith.constant 0 : index
    %0 = vector.load %arg1[%c0, %c0_0] : memref<8x8xf32, #tpu.memory_space<vmem>>, vector<8x8xf32>
    %c0_1 = arith.constant 0 : index
    %c0_2 = arith.constant 0 : index
    %1 = vector.load %arg4[%c0_1, %c0_2] : memref<16x256xf32, #tpu.memory_space<vmem>>, vector<8x256xf32>
    %cst = arith.constant dense<0.000000e+00> : vector<8x256xf32>
    %2 = tpu.matmul %0, %1, %cst {dimension_numbers = #tpu.dot_dimension_numbers<[1], [0], [0], [1], [0, 0, 1, 1], [], []>} : vector<8x8xf32>, vector<8x256xf32>, vector<8x256xf32> -> vector<8x256xf32>
    %c8 = arith.constant 8 : index
    %c0_3 = arith.constant 0 : index
    %3 = vector.load %arg4[%c8, %c0_3] : memref<16x256xf32, #tpu.memory_space<vmem>>, vector<1x256xf32>
    %4 = vector.broadcast %3 : vector<1x256xf32> to vector<8x256xf32>
    %5 = arith.addf %2, %4 : vector<8x256xf32>
    %6 = math.tanh %5 : vector<8x256xf32>
    %c0_4 = arith.constant 0 : index
    %c0_5 = arith.constant 0 : index
    %c0_6 = arith.constant 0 : index
    %7 = vector.load %arg2[%c0_4, %c0_5, %c0_6] : memref<2x256x256xf32, #tpu.memory_space<vmem>>, vector<1x256x256xf32>
    %8 = vector.shape_cast %7 : vector<1x256x256xf32> to vector<256x256xf32>
    %cst_7 = arith.constant dense<0.000000e+00> : vector<8x256xf32>
    %9 = tpu.matmul %6, %8, %cst_7 {dimension_numbers = #tpu.dot_dimension_numbers<[1], [0], [0], [1], [0, 0, 1, 1], [], []>} : vector<8x256xf32>, vector<256x256xf32>, vector<8x256xf32> -> vector<8x256xf32>
    %c9 = arith.constant 9 : index
    %c0_8 = arith.constant 0 : index
    %10 = vector.load %arg4[%c9, %c0_8] : memref<16x256xf32, #tpu.memory_space<vmem>>, vector<1x256xf32>
    %11 = vector.broadcast %10 : vector<1x256xf32> to vector<8x256xf32>
    %12 = arith.addf %9, %11 : vector<8x256xf32>
    %13 = math.tanh %12 : vector<8x256xf32>
    %c1 = arith.constant 1 : index
    %c0_9 = arith.constant 0 : index
    %c0_10 = arith.constant 0 : index
    %14 = vector.load %arg2[%c1, %c0_9, %c0_10] : memref<2x256x256xf32, #tpu.memory_space<vmem>>, vector<1x256x256xf32>
    %15 = vector.shape_cast %14 : vector<1x256x256xf32> to vector<256x256xf32>
    %cst_11 = arith.constant dense<0.000000e+00> : vector<8x256xf32>
    %16 = tpu.matmul %13, %15, %cst_11 {dimension_numbers = #tpu.dot_dimension_numbers<[1], [0], [0], [1], [0, 0, 1, 1], [], []>} : vector<8x256xf32>, vector<256x256xf32>, vector<8x256xf32> -> vector<8x256xf32>
    %c10 = arith.constant 10 : index
    %c0_12 = arith.constant 0 : index
    %17 = vector.load %arg4[%c10, %c0_12] : memref<16x256xf32, #tpu.memory_space<vmem>>, vector<1x256xf32>
    %18 = vector.broadcast %17 : vector<1x256xf32> to vector<8x256xf32>
    %19 = arith.addf %16, %18 : vector<8x256xf32>
    %20 = math.tanh %19 : vector<8x256xf32>
    %c0_13 = arith.constant 0 : index
    %c0_14 = arith.constant 0 : index
    %21 = vector.load %arg3[%c0_13, %c0_14] : memref<256x8xf32, #tpu.memory_space<vmem>>, vector<256x8xf32>
    %cst_15 = arith.constant dense<0.000000e+00> : vector<8x8xf32>
    %22 = tpu.matmul %20, %21, %cst_15 {dimension_numbers = #tpu.dot_dimension_numbers<[1], [0], [0], [1], [0, 0, 1, 1], [], []>} : vector<8x256xf32>, vector<256x8xf32>, vector<8x8xf32> -> vector<8x8xf32>
    %c11 = arith.constant 11 : index
    %c0_16 = arith.constant 0 : index
    %23 = vector.load %arg4[%c11, %c0_16] : memref<16x256xf32, #tpu.memory_space<vmem>>, vector<1x8xf32>
    %24 = vector.broadcast %23 : vector<1x8xf32> to vector<8x8xf32>
    %25 = arith.addf %22, %24 : vector<8x8xf32>
    %26 = math.tanh %25 : vector<8x8xf32>
    %cst_17 = arith.constant 5.000000e-01 : f32
    %27 = vector.broadcast %cst_17 : f32 to vector<8x8xf32>
    %28 = arith.mulf %27, %26 : vector<8x8xf32>
    %cst_18 = arith.constant 1.500000e+00 : f32
    %29 = vector.broadcast %cst_18 : f32 to vector<8x8xf32>
    %30 = arith.addf %28, %29 : vector<8x8xf32>
    %c0_19 = arith.constant 0 : index
    %c0_20 = arith.constant 0 : index
    %31 = vector.load %arg5[%c0_19, %c0_20] : memref<8x8xf32, #tpu.memory_space<vmem>>, vector<8x8xf32>
    tpu.vector_store %arg5[%c0_19, %c0_20], %30 {strides = array<i32>} : memref<8x8xf32, #tpu.memory_space<vmem>>, vector<8x8xf32>,
    return
  }
  func.func @transform_0(%arg0: i32) -> (i32, i32) {
    %c0_i32 = arith.constant 0 : i32
    %c0_i32_0 = arith.constant 0 : i32
    return %arg0, %c0_i32 : i32, i32
  }
  func.func @transform_1(%arg0: i32) -> (i32, i32, i32) {
    %c0_i32 = arith.constant 0 : i32
    %c0_i32_0 = arith.constant 0 : i32
    %c0_i32_1 = arith.constant 0 : i32
    %c0_i32_2 = arith.constant 0 : i32
    return %c0_i32, %c0_i32_0, %c0_i32_1 : i32, i32, i32
  }
  func.func @transform_2(%arg0: i32) -> (i32, i32) {
    %c0_i32 = arith.constant 0 : i32
    %c0_i32_0 = arith.constant 0 : i32
    %c0_i32_1 = arith.constant 0 : i32
    return %c0_i32, %c0_i32_0 : i32, i32
  }
  func.func @transform_3(%arg0: i32) -> (i32, i32) {
    %c0_i32 = arith.constant 0 : i32
    %c0_i32_0 = arith.constant 0 : i32
    %c0_i32_1 = arith.constant 0 : i32
    return %c0_i32, %c0_i32_0 : i32, i32
  }
  func.func @transform_4(%arg0: i32) -> (i32, i32) {
    %c0_i32 = arith.constant 0 : i32
    %c0_i32_0 = arith.constant 0 : i32
    return %arg0, %c0_i32 : i32, i32
  }
}

</mosaic_0001>

<bundles_post_ra>
// kernel: _forward_impl.1
= control target key start
LH: loop header
LB: loop body
LE: loop exit
PB: predicated region body
PF: predicated region fallthrough
CT: control target
= control target key end

     0   :  { %9 = vsyncpa [#allocation3], 0  ;;  %s616_s15 = smov [#allocation2]   ;;  %s780_s0 = inlined_call_operand.vmem [shape: f32[8,8], index: 0, kind: input, shape index: {}]   ;;  %s781_s1 = inlined_call_operand.hbm [shape: f32[2,256,256], index: 1, kind: input, shape index: {}]   ;;  %s782_s2 = inlined_call_operand.vmem [shape: f32[256,8], index: 2, kind: input, shape index: {}]   ;;  %s783_s3 = inlined_call_operand.vmem [shape: f32[16,256], index: 3, kind: input, shape index: {}]   ;;  %s784_s4 = inlined_call_operand.vmem [shape: f32[8,8], index: 4, kind: output, shape index: {}]  }
   0x1   :  { %s17_s16 = sshll.u32 %s616_s15, 4  ;;  %s18_s16 = int_to_ptr.vmem [resolvable:$true] %s17_s16 }
   0x2   :  { %s602_s17 = scalar_lea.vmem %s18_s16, 16384  ;;  %p607_p1 = scmp.lt.s32.totalorder %s18_s16, %s18_s16 }
   0x3   :  { %p603_p0 = scmp.ne.s32.totalorder %s18_s16, %s602_s17  ;;  %p608_p2 = scmp.lt.s32.totalorder %s602_s17, %s602_s17 }
   0x5   :  { %p609_p3 = por %p608_p2, %p607_p1 }
   0x7   :  { %p610_p4 = pnand %p609_p3, %p603_p0 }
   0x9   :  { %613 = shalt.err (!%p610_p4)
}
   0xa   :  { %s617_s18 = smov 256   ;;  %s618_s19 = smov 16  }
   0xb   :  { %23 = dma.hbm_to_vmem [thread:$0]  %s781_s1, 16384, %s18_s16, [#allocation3], %s617_s18, %s617_s18, %s618_s19  }
   0xc   :  { %614 = dma.done.wait [#allocation3], 16384  }
   0xd   :  { %615 = vsyncadd [#allocation3], 4294950912  ;;  %v619_v0 = vmov 0.0   ;;  %v33_v1 = vld [vmem:[%s783_s3 + $0x8] sm:$0xff]  ;;  %v32_v2 = vld [vmem:[%s783_s3] sm:$0xff]  ;;  %vm47_vm0 = vcmask 64512  }
   0xe   :  { %115 = vmatprep.mubr.f32.mxu0 %v619_v0  ;;  %v31_v3 = vld [vmem:[%s780_s0] sm:$0xff]  ;;  %81 = vmatprep.subr.mxu0 %v33_v1  ;;  %v155_v4 = vld [vmem:[#allocation2 + $0xf8] sm:$0xff]  ;;  %v154_v5 = vld [vmem:[#allocation2 + $0xf0] sm:$0xff] }
   0xf   :  { %v153_v6 = vld [vmem:[#allocation2 + $0xe8] sm:$0xff]  ;;  %82 = vmatpush1.msra.mxu0 %v32_v2  ;;  %201 = vmatprep.subr.mxu1 %v155_v4  ;;  %v152_v7 = vld [vmem:[#allocation2 + $0xe0] sm:$0xff]  ;;  %v151_v8 = vld [vmem:[#allocation2 + $0xd8] sm:$0xff] }
  0x10   :  { %538 = vmatmul.mubr.msk.f32.vlgmr.msra.gmra.mxu0 %vm47_vm0, %v31_v3  ;;  %202 = vmatpush1.msra.mxu1 %v154_v5  ;;  %v150_v9 = vld [vmem:[#allocation2 + $0xd0] sm:$0xff]  ;;  %v149_v10 = vld [vmem:[#allocation2 + $0xc8] sm:$0xff]  ;;  %v148_v11 = vld [vmem:[#allocation2 + $0xc0] sm:$0xff] }
  0x11   :  { %203 = vmatprep.subr.mxu1 %v153_v6  ;;  %v147_v12 = vld [vmem:[#allocation2 + $0xb8] sm:$0xff]  ;;  %v146_v13 = vld [vmem:[#allocation2 + $0xb0] sm:$0xff]  ;;  %v145_v14 = vld [vmem:[#allocation2 + $0xa8] sm:$0xff] }
  0x12   :  { %204 = vmatpush1.msra.mxu1 %v152_v7  ;;  %v144_v15 = vld [vmem:[#allocation2 + $0xa0] sm:$0xff]  ;;  %v143_v16 = vld [vmem:[#allocation2 + $0x98] sm:$0xff]  ;;  %v142_v17 = vld [vmem:[#allocation2 + $0x90] sm:$0xff] }
  0x13   :  { %205 = vmatprep.subr.mxu1 %v151_v8  ;;  %v141_v18 = vld [vmem:[#allocation2 + $0x88] sm:$0xff]  ;;  %v140_v19 = vld [vmem:[#allocation2 + $0x80] sm:$0xff]  ;;  %v139_v20 = vld [vmem:[#allocation2 + $0x78] sm:$0xff] }
  0x14   :  { %206 = vmatpush1.msra.mxu1 %v150_v9  ;;  %v138_v21 = vld [vmem:[#allocation2 + $0x70] sm:$0xff]  ;;  %v137_v22 = vld [vmem:[#allocation2 + $0x68] sm:$0xff]  ;;  %v136_v23 = vld [vmem:[#allocation2 + $0x60] sm:$0xff] }
  0x15   :  { %207 = vmatprep.subr.mxu1 %v149_v10  ;;  %v135_v24 = vld [vmem:[#allocation2 + $0x58] sm:$0xff]  ;;  %v134_v25 = vld [vmem:[#allocation2 + $0x50] sm:$0xff]  ;;  %v133_v26 = vld [vmem:[#allocation2 + $0x48] sm:$0xff] }
  0x16   :  { %208 = vmatpush1.msra.mxu1 %v148_v11  ;;  %v132_v27 = vld [vmem:[#allocation2 + $0x40] sm:$0xff]  ;;  %v131_v28 = vld [vmem:[#allocation2 + $0x38] sm:$0xff]  ;;  %v130_v29 = vld [vmem:[#allocation2 + $0x30] sm:$0xff] }
  0x17   :  { %209 = vmatprep.subr.mxu1 %v147_v12  ;;  %v129_v30 = vld [vmem:[#allocation2 + $0x28] sm:$0xff]  ;;  %v128_v31 = vld [vmem:[#allocation2 + $0x20] sm:$0xff]  ;;  %v127_v32 = vld [vmem:[#allocation2 + $0x18] sm:$0xff] }
  0x18   :  { %210 = vmatpush1.msra.mxu1 %v146_v13  ;;  %v126_v33 = vld [vmem:[#allocation2 + $0x10] sm:$0xff]  ;;  %v125_v34 = vld [vmem:[#allocation2 + $0x8] sm:$0xff]  ;;  %v124_v35 = vld [vmem:[#allocation2] sm:$0xff] }
  0x19   :  { %211 = vmatprep.subr.mxu1 %v145_v14  ;;  %v187_v36 = vld [vmem:[#allocation2 + $0x1f8] sm:$0xff]  ;;  %v186_v37 = vld [vmem:[#allocation2 + $0x1f0] sm:$0xff]  ;;  %v185_v38 = vld [vmem:[#allocation2 + $0x1e8] sm:$0xff] }
  0x1a   :  { %212 = vmatpush1.msra.mxu1 %v144_v15  ;;  %v184_v39 = vld [vmem:[#allocation2 + $0x1e0] sm:$0xff]  ;;  %v183_v40 = vld [vmem:[#allocation2 + $0x1d8] sm:$0xff]  ;;  %v182_v41 = vld [vmem:[#allocation2 + $0x1d0] sm:$0xff] }
  0x1b   :  { %213 = vmatprep.subr.mxu1 %v143_v16  ;;  %v181_v42 = vld [vmem:[#allocation2 + $0x1c8] sm:$0xff]  ;;  %v180_v43 = vld [vmem:[#allocation2 + $0x1c0] sm:$0xff]  ;;  %v179_v44 = vld [vmem:[#allocation2 + $0x1b8] sm:$0xff] }
  0x1c   :  { %214 = vmatpush1.msra.mxu1 %v142_v17  ;;  %v178_v45 = vld [vmem:[#allocation2 + $0x1b0] sm:$0xff]  ;;  %v177_v46 = vld [vmem:[#allocation2 + $0x1a8] sm:$0xff]  ;;  %v176_v47 = vld [vmem:[#allocation2 + $0x1a0] sm:$0xff] }
  0x1d   :  { %215 = vmatprep.subr.mxu1 %v141_v18  ;;  %v175_v48 = vld [vmem:[#allocation2 + $0x198] sm:$0xff]  ;;  %v174_v49 = vld [vmem:[#allocation2 + $0x190] sm:$0xff]  ;;  %v173_v50 = vld [vmem:[#allocation2 + $0x188] sm:$0xff] }
  0x1e   :  { %216 = vmatpush1.msra.mxu1 %v140_v19  ;;  %v172_v51 = vld [vmem:[#allocation2 + $0x180] sm:$0xff]  ;;  %v171_v52 = vld [vmem:[#allocation2 + $0x178] sm:$0xff]  ;;  %v170_v53 = vld [vmem:[#allocation2 + $0x170] sm:$0xff] }
  0x1f   :  { %217 = vmatprep.subr.mxu1 %v139_v20  ;;  %v169_v54 = vld [vmem:[#allocation2 + $0x168] sm:$0xff]  ;;  %v168_v55 = vld [vmem:[#allocation2 + $0x160] sm:$0xff]  ;;  %v167_v56 = vld [vmem:[#allocation2 + $0x158] sm:$0xff] }
  0x20   :  { %218 = vmatpush1.msra.mxu1 %v138_v21  ;;  %v166_v57 = vld [vmem:[#allocation2 + $0x150] sm:$0xff]  ;;  %v165_v58 = vld [vmem:[#allocation2 + $0x148] sm:$0xff]  ;;  %v164_v59 = vld [vmem:[#allocation2 + $0x140] sm:$0xff] }
  0x21   :  { %219 = vmatprep.subr.mxu1 %v137_v22  ;;  %v163_v60 = vld [vmem:[#allocation2 + $0x138] sm:$0xff]  ;;  %v162_v61 = vld [vmem:[#allocation2 + $0x130] sm:$0xff]  ;;  %v161_v62 = vld [vmem:[#allocation2 + $0x128] sm:$0xff] }
  0x22   :  { %220 = vmatpush1.msra.mxu1 %v136_v23  ;;  %v160_v63 = vld [vmem:[#allocation2 + $0x120] sm:$0xff]  ;;  %v159_v0 = vld [vmem:[#allocation2 + $0x118] sm:$0xff]  ;;  %v158_v1 = vld [vmem:[#allocation2 + $0x110] sm:$0xff] }
  0x23   :  { %221 = vmatprep.subr.mxu1 %v135_v24  ;;  %v157_v2 = vld [vmem:[#allocation2 + $0x108] sm:$0xff]  ;;  %v156_v3 = vld [vmem:[#allocation2 + $0x100] sm:$0xff]  ;;  %v306_v4 = vld [vmem:[#allocation2 + $0x2f8] sm:$0xff] }
  0x24   :  { %222 = vmatpush1.msra.mxu1 %v134_v25  ;;  %v305_v5 = vld [vmem:[#allocation2 + $0x2f0] sm:$0xff]  ;;  %v304_v6 = vld [vmem:[#allocation2 + $0x2e8] sm:$0xff]  ;;  %352 = vmatprep.subr.mxu0 %v306_v4  ;;  %v303_v7 = vld [vmem:[#allocation2 + $0x2e0] sm:$0xff] }
  0x25   :  { %223 = vmatprep.subr.mxu1 %v133_v26  ;;  %353 = vmatpush1.msra.mxu0 %v305_v5  ;;  %v302_v8 = vld [vmem:[#allocation2 + $0x2d8] sm:$0xff]  ;;  %v301_v9 = vld [vmem:[#allocation2 + $0x2d0] sm:$0xff]  ;;  %v300_v10 = vld [vmem:[#allocation2 + $0x2c8] sm:$0xff] }
  0x26   :  { %224 = vmatpush1.msra.mxu1 %v132_v27  ;;  %354 = vmatprep.subr.mxu0 %v304_v6  ;;  %v299_v11 = vld [vmem:[#allocation2 + $0x2c0] sm:$0xff]  ;;  %v298_v12 = vld [vmem:[#allocation2 + $0x2b8] sm:$0xff]  ;;  %v297_v13 = vld [vmem:[#allocation2 + $0x2b0] sm:$0xff] }
  0x27   :  { %225 = vmatprep.subr.mxu1 %v131_v28  ;;  %355 = vmatpush1.msra.mxu0 %v303_v7  ;;  %v296_v14 = vld [vmem:[#allocation2 + $0x2a8] sm:$0xff]  ;;  %v295_v15 = vld [vmem:[#allocation2 + $0x2a0] sm:$0xff]  ;;  %v294_v16 = vld [vmem:[#allocation2 + $0x298] sm:$0xff] }
  0x28   :  { %226 = vmatpush1.msra.mxu1 %v130_v29  ;;  %356 = vmatprep.subr.mxu0 %v302_v8  ;;  %v293_v17 = vld [vmem:[#allocation2 + $0x290] sm:$0xff]  ;;  %v292_v18 = vld [vmem:[#allocation2 + $0x288] sm:$0xff]  ;;  %v291_v19 = vld [vmem:[#allocation2 + $0x280] sm:$0xff] }
  0x29   :  { %227 = vmatprep.subr.mxu1 %v129_v30  ;;  %357 = vmatpush1.msra.mxu0 %v301_v9  ;;  %v290_v20 = vld [vmem:[#allocation2 + $0x278] sm:$0xff]  ;;  %v289_v21 = vld [vmem:[#allocation2 + $0x270] sm:$0xff]  ;;  %v288_v22 = vld [vmem:[#allocation2 + $0x268] sm:$0xff] }
  0x2a   :  { %228 = vmatpush1.msra.mxu1 %v128_v31  ;;  %358 = vmatprep.subr.mxu0 %v300_v10  ;;  %v287_v23 = vld [vmem:[#allocation2 + $0x260] sm:$0xff]  ;;  %v286_v24 = vld [vmem:[#allocation2 + $0x258] sm:$0xff]  ;;  %v285_v25 = vld [vmem:[#allocation2 + $0x250] sm:$0xff] }
  0x2b   :  { %229 = vmatprep.subr.mxu1 %v127_v32  ;;  %359 = vmatpush1.msra.mxu0 %v299_v11  ;;  %v284_v26 = vld [vmem:[#allocation2 + $0x248] sm:$0xff]  ;;  %v283_v27 = vld [vmem:[#allocation2 + $0x240] sm:$0xff]  ;;  %v282_v28 = vld [vmem:[#allocation2 + $0x238] sm:$0xff] }
  0x2c   :  { %230 = vmatpush1.msra.mxu1 %v126_v33  ;;  %360 = vmatprep.subr.mxu0 %v298_v12  ;;  %v281_v29 = vld [vmem:[#allocation2 + $0x230] sm:$0xff]  ;;  %v280_v30 = vld [vmem:[#allocation2 + $0x228] sm:$0xff]  ;;  %v279_v31 = vld [vmem:[#allocation2 + $0x220] sm:$0xff] }
  0x2d   :  { %231 = vmatprep.subr.mxu1 %v125_v34  ;;  %361 = vmatpush1.msra.mxu0 %v297_v13  ;;  %v278_v32 = vld [vmem:[#allocation2 + $0x218] sm:$0xff]  ;;  %v277_v33 = vld [vmem:[#allocation2 + $0x210] sm:$0xff]  ;;  %v276_v34 = vld [vmem:[#allocation2 + $0x208] sm:$0xff] }
  0x2e   :  { %232 = vmatpush1.msra.mxu1 %v124_v35  ;;  %362 = vmatprep.subr.mxu0 %v296_v14  ;;  %v275_v35 = vld [vmem:[#allocation2 + $0x200] sm:$0xff]  ;;  %v318_v5 = vld [vmem:[#allocation2 + $0x358] sm:$0xff]  ;;  %v317_v6 = vld [vmem:[#allocation2 + $0x350] sm:$0xff] }
  0x2f   :  { %233 = vmatprep.subr.mxu1 %v187_v36  ;;  %363 = vmatpush1.msra.mxu0 %v295_v15  ;;  %v338_v36 = vld [vmem:[#allocation2 + $0x3f8] sm:$0xff]  ;;  %v319_v4 = vld [vmem:[#allocation2 + $0x360] sm:$0xff]  ;;  %v316_v7 = vld [vmem:[#allocation2 + $0x348] sm:$0xff] }
  0x30   :  { %234 = vmatpush2.msra.mxu1 %v186_v37  ;;  %364 = vmatprep.subr.mxu0 %v294_v16  ;;  %v337_v37 = vld [vmem:[#allocation2 + $0x3f0] sm:$0xff]  ;;  %v315_v8 = vld [vmem:[#allocation2 + $0x340] sm:$0xff]  ;;  %v314_v9 = vld [vmem:[#allocation2 + $0x338] sm:$0xff] }
  0x31   :  { %235 = vmatprep.subr.mxu1 %v185_v38  ;;  %365 = vmatpush1.msra.mxu0 %v293_v17  ;;  %v336_v38 = vld [vmem:[#allocation2 + $0x3e8] sm:$0xff]  ;;  %v313_v10 = vld [vmem:[#allocation2 + $0x330] sm:$0xff]  ;;  %v311_v12 = vld [vmem:[#allocation2 + $0x320] sm:$0xff] }
  0x32   :  { %236 = vmatpush2.msra.mxu1 %v184_v39  ;;  %366 = vmatprep.subr.mxu0 %v292_v18  ;;  %v335_v39 = vld [vmem:[#allocation2 + $0x3e0] sm:$0xff]  ;;  %v312_v11 = vld [vmem:[#allocation2 + $0x328] sm:$0xff]  ;;  %v310_v13 = vld [vmem:[#allocation2 + $0x318] sm:$0xff] }
  0x33   :  { %237 = vmatprep.subr.mxu1 %v183_v40  ;;  %367 = vmatpush1.msra.mxu0 %v291_v19  ;;  %v334_v40 = vld [vmem:[#allocation2 + $0x3d8] sm:$0xff]  ;;  %v309_v14 = vld [vmem:[#allocation2 + $0x310] sm:$0xff]  ;;  %v308_v15 = vld [vmem:[#allocation2 + $0x308] sm:$0xff] }
  0x34   :  { %238 = vmatpush2.msra.mxu1 %v182_v41  ;;  %368 = vmatprep.subr.mxu0 %v290_v20  ;;  %v333_v41 = vld [vmem:[#allocation2 + $0x3d0] sm:$0xff]  ;;  %v307_v16 = vld [vmem:[#allocation2 + $0x300] sm:$0xff]  ;;  %v456_v17 = vld [vmem:[%s782_s2 + $0xf8] sm:$0xff] }
  0x35   :  { %239 = vmatprep.subr.mxu1 %v181_v42  ;;  %369 = vmatpush1.msra.mxu0 %v289_v21  ;;  %v332_v42 = vld [vmem:[#allocation2 + $0x3c8] sm:$0xff]  ;;  %v440_v18 = vld [vmem:[%s782_s2 + $0x78] sm:$0xff]  ;;  %v455_v19 = vld [vmem:[%s782_s2 + $0xf0] sm:$0xff] }
  0x36   :  { %240 = vmatpush2.msra.mxu1 %v180_v43  ;;  %370 = vmatprep.subr.mxu0 %v288_v22  ;;  %v331_v43 = vld [vmem:[#allocation2 + $0x3c0] sm:$0xff]  ;;  %v439_v20 = vld [vmem:[%s782_s2 + $0x70] sm:$0xff]  ;;  %v454_v21 = vld [vmem:[%s782_s2 + $0xe8] sm:$0xff] }
  0x37   :  { %241 = vmatprep.subr.mxu1 %v179_v44  ;;  %371 = vmatpush1.msra.mxu0 %v287_v23  ;;  %v330_v44 = vld [vmem:[#allocation2 + $0x3b8] sm:$0xff]  ;;  %v438_v22 = vld [vmem:[%s782_s2 + $0x68] sm:$0xff]  ;;  %v453_v23 = vld [vmem:[%s782_s2 + $0xe0] sm:$0xff] }
  0x38   :  { %242 = vmatpush2.msra.mxu1 %v178_v45  ;;  %372 = vmatprep.subr.mxu0 %v286_v24  ;;  %v329_v45 = vld [vmem:[#allocation2 + $0x3b0] sm:$0xff]  ;;  %v437_v24 = vld [vmem:[%s782_s2 + $0x60] sm:$0xff] }
  0x39   :  { %243 = vmatprep.subr.mxu1 %v177_v46  ;;  %373 = vmatpush1.msra.mxu0 %v285_v25  ;;  %v328_v46 = vld [vmem:[#allocation2 + $0x3a8] sm:$0xff]  ;;  %v452_v25 = vld [vmem:[%s782_s2 + $0xd8] sm:$0xff] }
  0x3a   :  { %244 = vmatpush2.msra.mxu1 %v176_v47  ;;  %374 = vmatprep.subr.mxu0 %v284_v26  ;;  %v327_v47 = vld [vmem:[#allocation2 + $0x3a0] sm:$0xff]  ;;  %v436_v26 = vld [vmem:[%s782_s2 + $0x58] sm:$0xff] }
  0x3b   :  { %245 = vmatprep.subr.mxu1 %v175_v48  ;;  %375 = vmatpush1.msra.mxu0 %v283_v27  ;;  %v37_v48 = vlaneseq  ;;  %v451_v27 = vld [vmem:[%s782_s2 + $0xd0] sm:$0xff] }
  0x3c   :  { %246 = vmatpush2.msra.mxu1 %v174_v49  ;;  %376 = vmatprep.subr.mxu0 %v282_v28  ;;  %v435_v28 = vld [vmem:[%s782_s2 + $0x50] sm:$0xff] }
  0x3d   :  { %247 = vmatprep.subr.mxu1 %v173_v50  ;;  %377 = vmatpush1.msra.mxu0 %v281_v29  ;;  %v38_v49 = vshrl.u32 %v37_v48, 7  ;;  %v539_v29 = vld [vmem:[%s783_s3 + $0x11] ss:$8 sm:$0x3]  ;;  %v445_v48 = vld [vmem:[%s782_s2 + $0xa0] sm:$0xff] }
  0x3e   :  { %248 = vmatpush2.msra.mxu1 %v172_v51  ;;  %378 = vmatprep.subr.mxu0 %v280_v30  ;;  %v537_v51 = vld [vmem:[%s783_s3 + $0x10] ss:$8 sm:$0x3] }
  0x3f   :  { %249 = vmatprep.subr.mxu1 %v171_v52  ;;  %379 = vmatpush1.msra.mxu0 %v279_v31  ;;  %v658_v50 = vsub.s32 0, %v38_v49  ;;  %v663_v52 = vsub.s32 1, %v38_v49  ;;  %v429_v49 = vld [vmem:[%s782_s2 + $0x20] sm:$0xff] }
  0x40   :  { %250 = vmatpush2.msra.mxu1 %v170_v53  ;;  %380 = vmatprep.subr.mxu0 %v278_v32 }
  0x41   :  { %251 = vmatprep.subr.mxu1 %v169_v54  ;;  %381 = vmatpush1.msra.mxu0 %v277_v33  ;;  %v40_v53 = vrot.slane %v537_v51, %v658_v50  ;;  %v44_v54 = vrot.slane %v537_v51, %v663_v52  ;;  %v194_v30 = vrot.slane %v539_v29, %v658_v50  ;;  %v444_v51 = vld [vmem:[%s782_s2 + $0x98] sm:$0xff] }
  0x42   :  { %252 = vmatpush2.msra.mxu1 %v168_v55  ;;  %382 = vmatprep.subr.mxu0 %v276_v34  ;;  %v198_v31 = vrot.slane %v539_v29, %v663_v52 }
  0x43   :  { %253 = vmatprep.subr.mxu1 %v167_v56  ;;  %383 = vmatpush1.msra.mxu0 %v275_v35 }
  0x44   :  { %254 = vmatpush2.msra.mxu1 %v166_v57  ;;  %384 = vmatprep.subr.mxu0 %v338_v36 }
  0x45   :  { %255 = vmatprep.subr.mxu1 %v165_v58  ;;  %385 = vmatpush2.msra.mxu0 %v337_v37 }
  0x46   :  { %256 = vmatpush2.msra.mxu1 %v164_v59  ;;  %386 = vmatprep.subr.mxu0 %v336_v38  ;;  %v450_v38 = vld [vmem:[%s782_s2 + $0xc8] sm:$0xff] }
  0x47   :  { %257 = vmatprep.subr.mxu1 %v163_v60  ;;  %387 = vmatpush2.msra.mxu0 %v335_v39  ;;  %v434_v39 = vld [vmem:[%s782_s2 + $0x48] sm:$0xff] }
  0x48   :  { %258 = vmatpush2.msra.mxu1 %v162_v61  ;;  %388 = vmatprep.subr.mxu0 %v334_v40  ;;  %v326_v61 = vld [vmem:[#allocation2 + $0x398] sm:$0xff]  ;;  %v449_v40 = vld [vmem:[%s782_s2 + $0xc0] sm:$0xff] }
  0x49   :  { %259 = vmatprep.subr.mxu1 %v161_v62  ;;  %389 = vmatpush2.msra.mxu0 %v333_v41  ;;  %v325_v62 = vld [vmem:[#allocation2 + $0x390] sm:$0xff]  ;;  %v433_v41 = vld [vmem:[%s782_s2 + $0x40] sm:$0xff] }
  0x4a   :  { %260 = vmatpush2.msra.mxu1 %v160_v63  ;;  %390 = vmatprep.subr.mxu0 %v332_v42  ;;  %v324_v63 = vld [vmem:[#allocation2 + $0x388] sm:$0xff]  ;;  %v448_v42 = vld [vmem:[%s782_s2 + $0xb8] sm:$0xff] }
  0x4b   :  { %261 = vmatprep.subr.mxu1 %v159_v0  ;;  %391 = vmatpush2.msra.mxu0 %v331_v43  ;;  %v323_v0 = vld [vmem:[#allocation2 + $0x380] sm:$0xff]  ;;  %v432_v43 = vld [vmem:[%s782_s2 + $0x38] sm:$0xff] }
  0x4c   :  { %262 = vmatpush2.msra.mxu1 %v158_v1  ;;  %392 = vmatprep.subr.mxu0 %v330_v44  ;;  %v322_v1 = vld [vmem:[#allocation2 + $0x378] sm:$0xff]  ;;  %v447_v44 = vld [vmem:[%s782_s2 + $0xb0] sm:$0xff] }
  0x4d   :  { %263 = vmatprep.subr.mxu1 %v157_v2  ;;  %393 = vmatpush2.msra.mxu0 %v329_v45  ;;  %v321_v2 = vld [vmem:[#allocation2 + $0x370] sm:$0xff] }
  0x4e   :  { %264 = vmatpush2.msra.mxu1 %v156_v3  ;;  %394 = vmatprep.subr.mxu0 %v328_v46  ;;  %v320_v3 = vld [vmem:[#allocation2 + $0x368] sm:$0xff]  ;;  %v431_v45 = vld [vmem:[%s782_s2 + $0x30] sm:$0xff] }
  0x4f   :  { %395 = vmatpush2.msra.mxu0 %v327_v47  ;;  %541 = vmatprep.subr.mxu1 %v456_v17  ;;  %v446_v46 = vld [vmem:[%s782_s2 + $0xa8] sm:$0xff] }
  0x50   :  { %396 = vmatprep.subr.mxu0 %v326_v61  ;;  %v430_v47 = vld [vmem:[%s782_s2 + $0x28] sm:$0xff] }
  0x51   :  { %397 = vmatpush2.msra.mxu0 %v325_v62 }
  0x52   :  { %398 = vmatprep.subr.mxu0 %v324_v63 }
  0x53   :  { %399 = vmatpush2.msra.mxu0 %v323_v0 }
  0x54   :  { %400 = vmatprep.subr.mxu0 %v322_v1 }
  0x55   :  { %401 = vmatpush2.msra.mxu0 %v321_v2 }
  0x56   :  { %402 = vmatprep.subr.mxu0 %v320_v3 }
  0x57   :  { %403 = vmatpush2.msra.mxu0 %v319_v4 }
  0x58   :  { %404 = vmatprep.subr.mxu0 %v318_v5 }
  0x59   :  { %405 = vmatpush2.msra.mxu0 %v317_v6  ;;  %v457_v6 = vld [vmem:[%s783_s3 + $0x13] ss:$0 sm:$0xff] }
  0x5a   :  { %406 = vmatprep.subr.mxu0 %v316_v7 }
  0x5b   :  { %407 = vmatpush2.msra.mxu0 %v315_v8 }
  0x5c   :  { %408 = vmatprep.subr.mxu0 %v314_v9 }
  0x5d   :  { %409 = vmatpush2.msra.mxu0 %v313_v10 }
  0x5e   :  { %410 = vmatprep.subr.mxu0 %v312_v11 }
  0x5f   :  { %411 = vmatpush2.msra.mxu0 %v311_v12 }
  0x60   :  { %412 = vmatprep.subr.mxu0 %v310_v13 }
  0x61   :  { %413 = vmatpush2.msra.mxu0 %v309_v14 }
  0x62   :  { %414 = vmatprep.subr.mxu0 %v308_v15 }
  0x63   :  { %415 = vmatpush2.msra.mxu0 %v307_v16 }
  0xd0   :  { %v117_v55 = vpop.f32.mrf.mxu0 }
  0xd1   :  { %v118_v56 = vadd.f32 %v117_v55, %v40_v53  ;;  %v428_v53 = vld [vmem:[%s782_s2 + $0x18] sm:$0xff]  ;;  %v427_v55 = vld [vmem:[%s782_s2 + $0x10] sm:$0xff] }
  0xd2   :  { %v119_v57 = vpop.f32.mrf.mxu0 }
  0xd3   :  { %v120_v58 = vadd.f32 %v119_v57, %v44_v54  ;;  %v443_v54 = vld [vmem:[%s782_s2 + $0x90] sm:$0xff]  ;;  %v426_v57 = vld [vmem:[%s782_s2 + $0x8] sm:$0xff] }
  0xd5   :  { %580 = vtanh.f32 %v120_v58  ;;  %v441_v58 = vld [vmem:[%s782_s2 + $0x80] sm:$0xff] }
  0xd6   :  { %582 = vtanh.f32 %v118_v56  ;;  %v442_v56 = vld [vmem:[%s782_s2 + $0x88] sm:$0xff] }
  0xe2   :  { %v581_v59 = vpop.eup %580 }
  0xe3   :  { %v583_v60 = vpop.eup %582  ;;  %265 = vmatprep.mubr.f32.mxu1 %v581_v59  ;;  %v425_v59 = vld [vmem:[%s782_s2] sm:$0xff] }
  0xe4   :  { %266 = vmatmul.mubr.f32.vlgmr.msra.gmra.mxu1 %v583_v60  ;;  %v540_v60 = vld [vmem:[%s783_s3 + $0x12] ss:$8 sm:$0x3] }
  0xe5   :  { %542 = vmatpush3.msra.mxu1 %v440_v18  ;;  %v345_v61 = vrot.slane %v540_v60, %v658_v50  ;;  %v349_v62 = vrot.slane %v540_v60, %v663_v52 }
  0xe6   :  { %543 = vmatprep.subr.mxu1 %v455_v19 }
  0xe7   :  { %544 = vmatpush3.msra.mxu1 %v439_v20 }
  0xe8   :  { %545 = vmatprep.subr.mxu1 %v454_v21 }
  0xe9   :  { %546 = vmatpush3.msra.mxu1 %v438_v22 }
  0xea   :  { %547 = vmatprep.subr.mxu1 %v453_v23 }
  0xeb   :  { %548 = vmatpush3.msra.mxu1 %v437_v24 }
  0xec   :  { %549 = vmatprep.subr.mxu1 %v452_v25 }
  0xed   :  { %550 = vmatpush3.msra.mxu1 %v436_v26 }
  0xee   :  { %551 = vmatprep.subr.mxu1 %v451_v27 }
  0xef   :  { %552 = vmatpush3.msra.mxu1 %v435_v28 }
  0xf0   :  { %553 = vmatprep.subr.mxu1 %v450_v38 }
  0xf1   :  { %554 = vmatpush3.msra.mxu1 %v434_v39 }
  0xf2   :  { %555 = vmatprep.subr.mxu1 %v449_v40 }
  0xf3   :  { %556 = vmatpush3.msra.mxu1 %v433_v41 }
  0xf4   :  { %557 = vmatprep.subr.mxu1 %v448_v42 }
  0xf5   :  { %558 = vmatpush3.msra.mxu1 %v432_v43 }
  0xf6   :  { %559 = vmatprep.subr.mxu1 %v447_v44 }
  0xf7   :  { %560 = vmatpush3.msra.mxu1 %v431_v45 }
  0xf8   :  { %561 = vmatprep.subr.mxu1 %v446_v46 }
  0xf9   :  { %562 = vmatpush3.msra.mxu1 %v430_v47 }
  0xfa   :  { %563 = vmatprep.subr.mxu1 %v445_v48 }
  0xfb   :  { %564 = vmatpush3.msra.mxu1 %v429_v49 }
  0xfc   :  { %565 = vmatprep.subr.mxu1 %v444_v51 }
  0xfd   :  { %566 = vmatpush3.msra.mxu1 %v428_v53 }
  0xfe   :  { %567 = vmatprep.subr.mxu1 %v443_v54 }
  0xff   :  { %568 = vmatpush3.msra.mxu1 %v427_v55 }
 0x100   :  { %569 = vmatprep.subr.mxu1 %v442_v56 }
 0x101   :  { %570 = vmatpush3.msra.mxu1 %v426_v57 }
 0x102   :  { %571 = vmatprep.subr.mxu1 %v441_v58 }
 0x103   :  { %572 = vmatpush3.msra.mxu1 %v425_v59 }
 0x1a4   :  { %v267_v32 = vpop.f32.mrf.mxu1 }
 0x1a5   :  { %v268_v33 = vadd.f32 %v267_v32, %v194_v30 }
 0x1a6   :  { %v269_v34 = vpop.f32.mrf.mxu1 }
 0x1a7   :  { %v270_v35 = vadd.f32 %v269_v34, %v198_v31 }
 0x1a9   :  { %584 = vtanh.f32 %v270_v35 }
 0x1aa   :  { %586 = vtanh.f32 %v268_v33 }
 0x1b6   :  { %v585_v36 = vpop.eup %584 }
 0x1b7   :  { %v587_v37 = vpop.eup %586  ;;  %416 = vmatprep.mubr.f32.mxu0 %v585_v36 }
 0x1b8   :  { %417 = vmatmul.mubr.f32.vlgmr.msra.gmra.mxu0 %v587_v37 }
 0x278   :  { %v418_v63 = vpop.f32.mrf.mxu0 }
 0x279   :  { %v419_v0 = vadd.f32 %v418_v63, %v345_v61 }
 0x27a   :  { %v420_v1 = vpop.f32.mrf.mxu0 }
 0x27b   :  { %v421_v2 = vadd.f32 %v420_v1, %v349_v62 }
 0x27d   :  { %588 = vtanh.f32 %v421_v2 }
 0x27e   :  { %590 = vtanh.f32 %v419_v0 }
 0x28a   :  { %v589_v3 = vpop.eup %588 }
 0x28b   :  { %v591_v4 = vpop.eup %590  ;;  %522 = vmatprep.mubr.f32.mxu1 %v589_v3 }
 0x28c   :  { %523 = vmatmul.mubr.f32.vlgmr.msra.gmra.mxu1 %v591_v4 }
 0x34c   :  { %v573_v5 = vpop.f32.mrf.mxu1 }
 0x34e   :  { %v574_v7 = vpop.f32.mrf.mxu1 }
 0x34f   :  { %v575_v8 = vadd.f32 %v574_v7, %v573_v5 }
 0x351   :  { %v525_v50 = vadd.f32 %v575_v8, %v457_v6 }
 0x353   :  { %592 = vtanh.f32 %v525_v50 }
 0x360   :  { %v593_v52 = vpop.eup %592 }
 0x361   :  { %v529_v9 = vmul.f32 0.5, %v593_v52 }
 0x363   :  { %v530_v10 = vadd.f32 1.5, %v529_v9 }
 0x365   :  { %531 = vst.msk [vmem:[%s784_s4] sm:$0xff] %vm47_vm0, %v530_v10 }
 0x366   :  { %536 = vsyncpa [#allocation3], 1 }

</bundles_post_ra>
